<compile_context>
chip_gen: v7x
topology: tpu7x:2x2x1
jax: 0.10.0
libtpu: 0.0.40
codegen_flags: <defaults>
</compile_context>

<pallas_src>
import functools

import jax
import jax.numpy as jnp
from jax.experimental import pallas as pl
from jax.experimental.pallas import tpu as pltpu


def _flat_kernel_model_kernel(xT_ref, ctrs_ref, wT_ref, outT_ref, *, ep):
    xT = xT_ref[...].astype(jnp.float32)   # (D, TB)      batch in lanes
    c = ctrs_ref[...]                      # (M_pad, D)   pre-normalized f32
    wT = wT_ref[...]                       # (O, M_pad)   f32, zero-padded columns

    # flag_normalize_x: unit-normalize each input point (columns of xT).
    inv_nx = jax.lax.rsqrt(jnp.sum(xT * xT, axis=0, keepdims=True))   # (1, TB)
    xT = xT * inv_nx

    # Direct pairwise squared distances, feature dim (D=4) unrolled on the VPU.
    d_feat = xT.shape[0]
    diff = c[:, 0:1] - xT[0:1, :]                     # (M_pad, TB)
    d2 = diff * diff
    for d in range(1, d_feat):
        diff = c[:, d:d + 1] - xT[d:d + 1, :]
        d2 = d2 + diff * diff
    r = jnp.sqrt(d2)

    # Matern smoothness k=2, Horner form.
    epr = ep * r
    k_mat_T = jnp.exp(-epr) * (3.0 + epr * (3.0 + epr))   # (M_pad, TB)

    # (O, M_pad) @ (M_pad, TB) on the MXU; contraction K = M_pad = 128 (native).
    outT_ref[...] = jnp.dot(
        wT, k_mat_T, preferred_element_type=jnp.float32
    ).astype(outT_ref.dtype)


def _pick_tile_b(B):
    # Prefer big lane-dense tiles, but keep >= 2 grid steps when possible (v7x
    # megacore sharding of the 'parallel' batch axis).
    for t in (1024, 512, 256, 128):
        if B % t == 0 and B // t >= 2:
            return t
    for t in (1024, 512, 256, 128):
        if B % t == 0:
            return t
    return B  # single grid step; block last dim == full array dim is always legal


def flat_kernel_model_forward(x, ctrs, coeffs, *, ep=1.0, tile_b=None):
    """Pallas implementation of FlatKernelModel.forward (flag_lagrange=False)."""
    B, D = x.shape
    M, D2 = ctrs.shape
    assert D == D2
    Mw, O = coeffs.shape
    assert Mw == M

    if tile_b is None:
        tile_b = _pick_tile_b(B)
    assert B % tile_b == 0, "batch must be divisible by the batch tile"

    # ---- one-time wrapper prep (hoisted out of the grid loop) ----
    # flag_normalize_y: L2-normalize the centers once.
    c32 = jnp.asarray(ctrs, jnp.float32)
    cn = c32 * jax.lax.rsqrt(jnp.sum(c32 * c32, axis=-1, keepdims=True))
    w32 = jnp.asarray(coeffs, jnp.float32)

    # Pad M up to a multiple of 128: padded centers are finite unit vectors (e0)
    # paired with zero coefficient rows, so they contribute nothing to the output.
    M_pad = max(128, ((M + 127) // 128) * 128)
    if M_pad != M:
        pad_c = jnp.zeros((M_pad - M, D), jnp.float32).at[:, 0].set(1.0)
        cn = jnp.concatenate([cn, pad_c], axis=0)
        w32 = jnp.concatenate([w32, jnp.zeros((M_pad - M, O), jnp.float32)], axis=0)

    wT = w32.T                                  # (O, M_pad)
    xT = jnp.asarray(x, jnp.float32).T          # (D, B)  batch in lanes

    kernel = functools.partial(_flat_kernel_model_kernel, ep=float(ep))

    outT = pl.pallas_call(
        kernel,
        out_shape=jax.ShapeDtypeStruct((O, B), jnp.float32),
        grid_spec=pltpu.PrefetchScalarGridSpec(
            num_scalar_prefetch=0,
            grid=(B // tile_b,),
            in_specs=[
                pl.BlockSpec((D, tile_b), lambda i: (0, i)),    # x^T tile
                pl.BlockSpec((M_pad, D), lambda i: (0, 0)),     # centers (resident)
                pl.BlockSpec((O, M_pad), lambda i: (0, 0)),     # coeffs^T (resident)
            ],
            out_specs=pl.BlockSpec((O, tile_b), lambda i: (0, i)),
        ),
        compiler_params=pltpu.CompilerParams(
            dimension_semantics=("parallel",),
        ),
    )(xT, cn, wT)

    # Back to (B, O); .squeeze() mirrors the PyTorch forward.
    return jnp.squeeze(outT.T)


def _reference_forward(x, ctrs, coeffs, ep=1.0):
    """Plain-JAX reference for correctness checking."""
    xn = x / jnp.linalg.norm(x, axis=-1, keepdims=True)
    cn = ctrs / jnp.linalg.norm(ctrs, axis=-1, keepdims=True)
    r = jnp.sqrt(jnp.sum((xn[:, None, :] - cn[None, :, :]) ** 2, axis=-1))
    epr = ep * r
    k_mat = jnp.exp(-epr) * (3.0 + 3.0 * epr + epr * epr)
    return jnp.squeeze(k_mat @ coeffs)


if __name__ == "__main__":
    # Small shapes consistent with the module: in_N=4 features, out_N=3 outputs,
    # 100 centers (module default), batch of 8 input points.
    B, in_N, out_N, M = 8, 4, 3, 100
    ep = 1.0

    key = jax.random.PRNGKey(0)
    kx, kc, kw = jax.random.split(key, 3)

    x = jax.random.uniform(kx, (B, in_N), jnp.float32, minval=-1.0, maxval=1.0)
    # ctrs = torch.rand(100, in_N) * 2 - 1
    ctrs = jax.random.uniform(kc, (M, in_N), jnp.float32, minval=-1.0, maxval=1.0)
    # coeffs = 0.1 * torch.randn(100, out_N)
    coeffs = 0.1 * jax.random.normal(kw, (M, out_N), jnp.float32)

    y = flat_kernel_model_forward(x, ctrs, coeffs, ep=ep)
    y = jax.block_until_ready(y)

    y_ref = _reference_forward(x, ctrs, coeffs, ep=ep)
    assert y.shape == y_ref.shape == (B, out_N)
    assert jnp.allclose(y, y_ref, atol=1e-4, rtol=1e-4), "mismatch vs reference"

    print("KERNEL_OK")
</pallas_src>

<mosaic_0001>
module attributes {stable_mosaic.version = 11 : i64} {
  func.func @_flat_kernel_model_kernel(%arg0: i32, %arg1: memref<4x8xf32, #tpu.memory_space<vmem>>, %arg2: memref<128x4xf32, #tpu.memory_space<vmem>>, %arg3: memref<3x128xf32, #tpu.memory_space<vmem>>, %arg4: memref<3x8xf32, #tpu.memory_space<vmem>>) attributes {dimension_semantics = [#tpu.dimension_semantics<parallel>], iteration_bounds = array<i64: 1>, scalar_prefetch = 0 : i64, scratch_operands = 0 : i64, tpu.core_type = #tpu.core_type<tc>, window_params = [{transform_indices = @transform_0, window_bounds = array<i64: 4, 8>}, {pipeline_mode = #tpu.pipeline_mode<synchronous>, transform_indices = @transform_1, window_bounds = array<i64: 128, 4>}, {pipeline_mode = #tpu.pipeline_mode<synchronous>, transform_indices = @transform_2, window_bounds = array<i64: 3, 128>}, {transform_indices = @transform_3, window_bounds = array<i64: 3, 8>}]} {
    %c0 = arith.constant 0 : index
    %c0_0 = arith.constant 0 : index
    %0 = vector.load %arg1[%c0, %c0_0] : memref<4x8xf32, #tpu.memory_space<vmem>>, vector<4x8xf32>
    %c0_1 = arith.constant 0 : index
    %c0_2 = arith.constant 0 : index
    %1 = vector.load %arg2[%c0_1, %c0_2] : memref<128x4xf32, #tpu.memory_space<vmem>>, vector<128x4xf32>
    %c0_3 = arith.constant 0 : index
    %c0_4 = arith.constant 0 : index
    %2 = vector.load %arg3[%c0_3, %c0_4] : memref<3x128xf32, #tpu.memory_space<vmem>>, vector<3x128xf32>
    %3 = arith.mulf %0, %0 : vector<4x8xf32>
    %cst = arith.constant dense<0.000000e+00> : vector<8xf32>
    %4 = vector.multi_reduction <add>, %3, %cst [0] : vector<4x8xf32> to vector<8xf32>
    %5 = vector.shape_cast %4 : vector<8xf32> to vector<1x8xf32>
    %6 = math.rsqrt %5 : vector<1x8xf32>
    %7 = vector.broadcast %6 : vector<1x8xf32> to vector<4x8xf32>
    %8 = arith.mulf %0, %7 : vector<4x8xf32>
    %9 = vector.extract_strided_slice %1 {offsets = [0, 0], sizes = [128, 1], strides = [1, 1]} : vector<128x4xf32> to vector<128x1xf32>
    %10 = vector.extract_strided_slice %8 {offsets = [0, 0], sizes = [1, 8], strides = [1, 1]} : vector<4x8xf32> to vector<1x8xf32>
    %11 = vector.broadcast %9 : vector<128x1xf32> to vector<128x8xf32>
    %12 = vector.broadcast %10 : vector<1x8xf32> to vector<128x8xf32>
    %13 = arith.subf %11, %12 : vector<128x8xf32>
    %14 = arith.mulf %13, %13 : vector<128x8xf32>
    %15 = vector.extract_strided_slice %1 {offsets = [0, 1], sizes = [128, 1], strides = [1, 1]} : vector<128x4xf32> to vector<128x1xf32>
    %16 = vector.extract_strided_slice %8 {offsets = [1, 0], sizes = [1, 8], strides = [1, 1]} : vector<4x8xf32> to vector<1x8xf32>
    %17 = vector.broadcast %15 : vector<128x1xf32> to vector<128x8xf32>
    %18 = vector.broadcast %16 : vector<1x8xf32> to vector<128x8xf32>
    %19 = arith.subf %17, %18 : vector<128x8xf32>
    %20 = arith.mulf %19, %19 : vector<128x8xf32>
    %21 = arith.addf %14, %20 : vector<128x8xf32>
    %22 = vector.extract_strided_slice %1 {offsets = [0, 2], sizes = [128, 1], strides = [1, 1]} : vector<128x4xf32> to vector<128x1xf32>
    %23 = vector.extract_strided_slice %8 {offsets = [2, 0], sizes = [1, 8], strides = [1, 1]} : vector<4x8xf32> to vector<1x8xf32>
    %24 = vector.broadcast %22 : vector<128x1xf32> to vector<128x8xf32>
    %25 = vector.broadcast %23 : vector<1x8xf32> to vector<128x8xf32>
    %26 = arith.subf %24, %25 : vector<128x8xf32>
    %27 = arith.mulf %26, %26 : vector<128x8xf32>
    %28 = arith.addf %21, %27 : vector<128x8xf32>
    %29 = vector.extract_strided_slice %1 {offsets = [0, 3], sizes = [128, 1], strides = [1, 1]} : vector<128x4xf32> to vector<128x1xf32>
    %30 = vector.extract_strided_slice %8 {offsets = [3, 0], sizes = [1, 8], strides = [1, 1]} : vector<4x8xf32> to vector<1x8xf32>
    %31 = vector.broadcast %29 : vector<128x1xf32> to vector<128x8xf32>
    %32 = vector.broadcast %30 : vector<1x8xf32> to vector<128x8xf32>
    %33 = arith.subf %31, %32 : vector<128x8xf32>
    %34 = arith.mulf %33, %33 : vector<128x8xf32>
    %35 = arith.addf %28, %34 : vector<128x8xf32>
    %36 = math.sqrt %35 : vector<128x8xf32>
    %cst_5 = arith.constant 1.000000e+00 : f32
    %37 = vector.broadcast %cst_5 : f32 to vector<128x8xf32>
    %38 = arith.mulf %37, %36 : vector<128x8xf32>
    %cst_6 = arith.constant 0.000000e+00 : f32
    %39 = vector.broadcast %cst_6 : f32 to vector<128x8xf32>
    %40 = arith.subf %39, %38 : vector<128x8xf32>
    %41 = math.exp %40 : vector<128x8xf32>
    %cst_7 = arith.constant 3.000000e+00 : f32
    %42 = vector.broadcast %cst_7 : f32 to vector<128x8xf32>
    %43 = arith.addf %42, %38 : vector<128x8xf32>
    %44 = arith.mulf %38, %43 : vector<128x8xf32>
    %cst_8 = arith.constant 3.000000e+00 : f32
    %45 = vector.broadcast %cst_8 : f32 to vector<128x8xf32>
    %46 = arith.addf %45, %44 : vector<128x8xf32>
    %47 = arith.mulf %41, %46 : vector<128x8xf32>
    %cst_9 = arith.constant dense<0.000000e+00> : vector<3x8xf32>
    %48 = tpu.matmul %2, %47, %cst_9 {dimension_numbers = #tpu.dot_dimension_numbers<[1], [0], [0], [1], [0, 0, 1, 1], [], []>} : vector<3x128xf32>, vector<128x8xf32>, vector<3x8xf32> -> vector<3x8xf32>
    %c0_10 = arith.constant 0 : index
    %c0_11 = arith.constant 0 : index
    %49 = vector.load %arg4[%c0_10, %c0_11] : memref<3x8xf32, #tpu.memory_space<vmem>>, vector<3x8xf32>
    tpu.vector_store %arg4[%c0_10, %c0_11], %48 {strides = array<i32>} : memref<3x8xf32, #tpu.memory_space<vmem>>, vector<3x8xf32>,
    return
  }
  func.func @transform_0(%arg0: i32) -> (i32, i32) {
    %c0_i32 = arith.constant 0 : i32
    %c0_i32_0 = arith.constant 0 : i32
    return %c0_i32, %arg0 : i32, i32
  }
  func.func @transform_1(%arg0: i32) -> (i32, i32) {
    %c0_i32 = arith.constant 0 : i32
    %c0_i32_0 = arith.constant 0 : i32
    %c0_i32_1 = arith.constant 0 : i32
    return %c0_i32, %c0_i32_0 : i32, i32
  }
  func.func @transform_2(%arg0: i32) -> (i32, i32) {
    %c0_i32 = arith.constant 0 : i32
    %c0_i32_0 = arith.constant 0 : i32
    %c0_i32_1 = arith.constant 0 : i32
    return %c0_i32, %c0_i32_0 : i32, i32
  }
  func.func @transform_3(%arg0: i32) -> (i32, i32) {
    %c0_i32 = arith.constant 0 : i32
    %c0_i32_0 = arith.constant 0 : i32
    return %c0_i32, %arg0 : i32, i32
  }
}

</mosaic_0001>

<bundles_post_ra>
// kernel: tpu_custom_call.1
= control target key start
LH: loop header
LB: loop body
LE: loop exit
PB: predicated region body
PF: predicated region fallthrough
CT: control target
= control target key end

     0   :  { %v1029_v1 = vmov 2   ;;  %v1030_v2 = vmov 1   ;;  %s1410_s0 = inlined_call_operand.vmem [shape: f32[4,8], index: 0, kind: input, shape index: {}]   ;;  %s1411_s1 = inlined_call_operand.vmem [shape: f32[128,4], index: 1, kind: input, shape index: {}]   ;;  %s1412_s2 = inlined_call_operand.vmem [shape: f32[3,128], index: 2, kind: input, shape index: {}]   ;;  %s1413_s3 = inlined_call_operand.hbm [shape: f32[3,8], index: 3, kind: output, shape index: {}]  }
   0x1   :  { %v16_v0 = vld [vmem:[%s1411_s1] sm:$0xff]  ;;  %903 = vset.pattern.permute.xlu0 %v1029_v1  ;;  %902 = vset.pattern.permute.xlu1 %v1030_v2  ;;  %v19_v3 = vld [vmem:[%s1411_s1 + $0x18] sm:$0xff]  ;;  %v17_v4 = vld [vmem:[%s1411_s1 + $0x8] sm:$0xff] }
   0x2   :  { %277 = vperm.xlu0 %903, %v16_v0   ;;  %161 = vperm.xlu1 %902, %v16_v0  }
   0x3   :  { %8 = vsyncpa [#allocation3], 0  ;;  %v22_v5 = vld [vmem:[%s1411_s1 + $0x30] sm:$0xff]  ;;  %v1075_v6 = vld [vmem:[%s1411_s1 + $0x48] sm:$0xff]  ;;  %v1031_v8 = vmov 0   ;;  %v1032_v13 = vmov 3   ;;  %v124_v40 = vlaneseq }
   0x4   :  { %v18_v7 = vld [vmem:[%s1411_s1 + $0x10] sm:$0xff]  ;;  %v20_v9 = vld [vmem:[%s1411_s1 + $0x20] sm:$0xff]  ;;  %v23_v10 = vld [vmem:[%s1411_s1 + $0x38] sm:$0xff]  ;;  %v1033_v18 = vmov 0.0|0.0   ;;  %vm34_vm0 = vcmask 60416   ;;  %vm1034_vm13 = vmmov 0  }
   0x5   :  { %v1093_v11 = vld [vmem:[%s1411_s1 + $0x50] sm:$0xff]  ;;  %v1099_v12 = vld [vmem:[%s1411_s1 + $0x68] sm:$0xff]  ;;  %v1115_v15 = vld [vmem:[%s1411_s1 + $0x60] sm:$0xff]  ;;  %870 = vmatprep.subr.bf16.mxu0 %v1033_v18  ;;  %v125_v43 = vshrl.u32 %v124_v40, 7  ;;  %s1036_s19 = smov [#allocation2]  }
   0x6   :  { %289 = vperm.xlu0 %903, %v19_v3   ;;  %165 = vperm.xlu1 %902, %v17_v4   ;;  %v21_v14 = vld [vmem:[%s1411_s1 + $0x28] sm:$0xff]  ;;  %v1121_v16 = vld [vmem:[%s1411_s1 + $0x78] sm:$0xff]  ;;  %v24_v17 = vld [vmem:[%s1411_s1 + $0x40] sm:$0xff]  ;;  %s810_s20 = sshll.u32 %s1036_s19, 4  ;;  %s811_s20 = int_to_ptr.vmem [resolvable:$true] %s810_s20 }
   0x7   :  { %v15_v19 = vld [vmem:[%s1410_s0] sm:$0xf]  ;;  %v27_v21 = vld [vmem:[%s1411_s1 + $0x58] sm:$0xff]  ;;  %v226_v47 = vsub.s32 1, %v125_v43  ;;  %v342_v49 = vsub.s32 2, %v125_v43  ;;  %v126_v50 = vsub.s32 0, %v125_v43  ;;  %p1010_p1 = scmp.lt.s32.totalorder %s811_s20, %s811_s20 }
   0x8   :  { %v33_v20 = vmul.f32 %v15_v19, %v15_v19  ;;  %v30_v54 = vld [vmem:[%s1411_s1 + $0x70] sm:$0xff]  ;;  %v458_v58 = vsub.s32 3, %v125_v43  ;;  %s1005_s21 = scalar_lea.vmem %s811_s20, 64 }
   0x9   :  { %p1006_p0 = scmp.ne.s32.totalorder %s811_s20, %s1005_s21  ;;  %p1011_p2 = scmp.lt.s32.totalorder %s1005_s21, %s1005_s21 }
   0xa   :  { %301 = vperm.xlu0 %903, %v22_v5   ;;  %904 = vset.pattern.permute.xlu1 %v1029_v1  ;;  %v35_v22 = vsel %vm34_vm0, %v33_v20, 0.0 }
   0xb   :  { %281 = vperm.xlu1 %904, %v17_v4   ;;  %v36_v23 = vrot.slane %v35_v22, 4  ;;  %p1012_p3 = por %p1011_p2, %p1010_p1 }
   0xd   :  { %v37_v24 = vadd.f32 %v36_v23, %v35_v22  ;;  %p1013_p4 = pnand %p1012_p3, %p1006_p0 }
   0xe   :  { %313 = vperm.xlu0 %903, %v1075_v6  }
   0xf   :  { %905 = vset.pattern.permute.xlu1 %v1031_v8  ;;  %v38_v27 = vrot.slane %v37_v24, 2 }
  0x10   :  { %56 = vperm.xlu1 %905, %v18_v7  }
  0x11   :  { %v39_v30 = vadd.f32 %v38_v27, %v37_v24 }
  0x12   :  { %921 = vset.pattern.permute.xlu0 %v1030_v2 }
  0x13   :  { %177 = vperm.xlu0 %921, %v20_v9   ;;  %v40_v33 = vrot.slane %v39_v30, 1 }
  0x14   :  { %906 = vset.pattern.permute.xlu1 %v1030_v2 }
  0x15   :  { %169 = vperm.xlu1 %906, %v18_v7   ;;  %v41_v35 = vadd.f32 %v40_v33, %v39_v30 }
  0x17   :  { %189 = vperm.xlu0 %921, %v23_v10   ;;  %939 = vrsqrt.f32 %v41_v35 }
  0x19   :  { %173 = vperm.xlu1 %906, %v19_v3  }
  0x1b   :  { %201 = vperm.xlu0 %921, %v1093_v11  }
  0x1d   :  { %907 = vset.pattern.permute.xlu1 %v1032_v13 }
  0x1e   :  { %397 = vperm.xlu1 %907, %v17_v4  }
  0x1f   :  { %213 = vperm.xlu0 %921, %v1099_v12  }
  0x21   :  { %v940_v44 = vpop.eup %939 }
  0x22   :  { %908 = vset.pattern.permute.xlu1 %v1029_v1  ;;  %v43_v48 = vmul.f32 %v940_v44, %v15_v19 }
  0x23   :  { %928 = vset.pattern.permute.xlu0 %v1031_v8  ;;  %285 = vperm.xlu1 %908, %v18_v7  }
  0x24   :  { %46 = vperm.xlu0 %928, %v16_v0   ;;  %v1185_v53 = vrot.slane %v43_v48, %v226_v47  ;;  %v1190_v55 = vrot.slane %v43_v48, %v342_v49  ;;  %v1193_v57 = vrot.slane %v43_v48, %v126_v50 }
  0x27   :  { %909 = vset.pattern.permute.xlu1 %v1031_v8 }
  0x28   :  { %51 = vperm.xlu0 %928, %v17_v4   ;;  %66 = vperm.xlu1 %909, %v20_v9  }
  0x2c   :  { %61 = vperm.xlu0 %928, %v19_v3   ;;  %71 = vperm.xlu1 %909, %v21_v14  }
  0x30   :  { %76 = vperm.xlu0 %928, %v22_v5   ;;  %910 = vset.pattern.permute.xlu1 %v1030_v2 }
  0x31   :  { %181 = vperm.xlu1 %910, %v21_v14  }
  0x34   :  { %91 = vperm.xlu0 %928, %v1075_v6  }
  0x35   :  { %911 = vset.pattern.permute.xlu1 %v1032_v13 }
  0x36   :  { %401 = vperm.xlu1 %911, %v18_v7  }
  0x38   :  { %106 = vperm.xlu0 %928, %v1115_v15  }
  0x3a   :  { %912 = vset.pattern.permute.xlu1 %v1029_v1 }
  0x3b   :  { %293 = vperm.xlu1 %912, %v20_v9  }
  0x3c   :  { %121 = vperm.xlu0 %928, %v1121_v16  }
  0x3f   :  { %297 = vperm.xlu1 %912, %v21_v14  }
  0x40   :  { %932 = vset.pattern.permute.xlu0 %v1032_v13 }
  0x41   :  { %393 = vperm.xlu0 %932, %v16_v0   ;;  %v1200_v0 = vrot.slane %v43_v48, %v458_v58 }
  0x43   :  { %913 = vset.pattern.permute.xlu1 %v1031_v8 }
  0x44   :  { %81 = vperm.xlu1 %913, %v23_v10  }
  0x45   :  { %405 = vperm.xlu0 %932, %v19_v3  }
  0x48   :  { %914 = vset.pattern.permute.xlu1 %v1030_v2 }
  0x49   :  { %185 = vperm.xlu1 %914, %v22_v5   ;;  %417 = vperm.xlu0 %932, %v22_v5  }
  0x4d   :  { %915 = vset.pattern.permute.xlu1 %v1032_v13  ;;  %429 = vperm.xlu0 %932, %v1075_v6  }
  0x4e   :  { %409 = vperm.xlu1 %915, %v20_v9  }
  0x51   :  { %441 = vperm.xlu0 %932, %v1115_v15  }
  0x52   :  { %413 = vperm.xlu1 %915, %v21_v14  }
  0x55   :  { %934 = vset.pattern.permute.xlu0 %v1029_v1 }
  0x56   :  { %916 = vset.pattern.permute.xlu1 %v1029_v1  ;;  %325 = vperm.xlu0 %934, %v1115_v15  }
  0x57   :  { %305 = vperm.xlu1 %916, %v23_v10  }
  0x5a   :  { %337 = vperm.xlu0 %934, %v1121_v16  }
  0x5b   :  { %917 = vset.pattern.permute.xlu1 %v1031_v8 }
  0x5c   :  { %86 = vperm.xlu1 %917, %v24_v17  }
  0x5e   :  { %938 = vset.pattern.permute.xlu0 %v1032_v13 }
  0x60   :  { %918 = vset.pattern.permute.xlu1 %v1030_v2 }
  0x61   :  { %193 = vperm.xlu1 %918, %v24_v17  }
  0x65   :  { %197 = vperm.xlu1 %918, %v1075_v6  }
  0x69   :  { %919 = vset.pattern.permute.xlu1 %v1032_v13 }
  0x6a   :  { %421 = vperm.xlu1 %919, %v23_v10  }
  0x6e   :  { %920 = vset.pattern.permute.xlu1 %v1029_v1 }
  0x6f   :  { %309 = vperm.xlu1 %920, %v24_v17  }
  0x73   :  { %922 = vset.pattern.permute.xlu1 %v1031_v8 }
  0x74   :  { %96 = vperm.xlu1 %922, %v1093_v11  }
  0x78   :  { %101 = vperm.xlu1 %922, %v27_v21  }
  0x7c   :  { %923 = vset.pattern.permute.xlu1 %v1030_v2 }
  0x7d   :  { %205 = vperm.xlu1 %923, %v27_v21  }
  0x81   :  { %924 = vset.pattern.permute.xlu1 %v1032_v13  ;;  %v1155_v25 = vpop.permute.xlu1 %161  ;;  %v1157_v26 = vpop.permute.xlu0 %277 }
  0x82   :  { %425 = vperm.xlu1 %924, %v24_v17   ;;  %v344_v43 = vsub.f32 %v1157_v26, %v1190_v55 }
  0x84   :  { %v360_v49 = vmul.f32 %v344_v43, %v344_v43 }
  0x85   :  { %v166_v28 = vpop.permute.xlu1 %165  ;;  %v1159_v29 = vpop.permute.xlu0 %289 }
  0x86   :  { %925 = vset.pattern.permute.xlu1 %v1029_v1  ;;  %v229_v56 = vsub.f32 %v166_v28, %v1185_v53 }
  0x87   :  { %317 = vperm.xlu1 %925, %v1093_v11  }
  0x88   :  { %v245_v62 = vmul.f32 %v229_v56, %v229_v56 }
  0x89   :  { %v1163_v31 = vpop.permute.xlu0 %301 }
  0x8a   :  { %v282_v32 = vpop.permute.xlu1 %281 }
  0x8b   :  { %321 = vperm.xlu1 %925, %v27_v21   ;;  %v345_v63 = vsub.f32 %v282_v32, %v1190_v55 }
  0x8d   :  { %v1165_v34 = vpop.permute.xlu0 %313  ;;  %v361_v7 = vmul.f32 %v345_v63, %v345_v63 }
  0x8f   :  { %926 = vset.pattern.permute.xlu1 %v1031_v8  ;;  %v57_v36 = vpop.permute.xlu1 %56 }
  0x90   :  { %111 = vperm.xlu1 %926, %v1099_v12  }
  0x92   :  { %v1169_v37 = vpop.permute.xlu0 %177 }
  0x94   :  { %927 = vset.pattern.permute.xlu1 %v1030_v2  ;;  %v170_v38 = vpop.permute.xlu1 %169 }
  0x95   :  { %209 = vperm.xlu1 %927, %v1115_v15  }
  0x96   :  { %v1173_v39 = vpop.permute.xlu0 %189 }
  0x98   :  { %v1175_v41 = vpop.permute.xlu1 %173 }
  0x99   :  { %929 = vset.pattern.permute.xlu1 %v1032_v13 }
  0x9a   :  { %433 = vperm.xlu1 %929, %v1093_v11   ;;  %v1179_v42 = vpop.permute.xlu0 %201  ;;  %v130_v11 = vsub.f32 %v57_v36, %v1193_v57  ;;  %v228_v36 = vsub.f32 %v1155_v25, %v1185_v53  ;;  %v231_v25 = vsub.f32 %v1175_v41, %v1185_v53 }
  0x9c   :  { %v244_v47 = vmul.f32 %v228_v36, %v228_v36 }
  0x9d   :  { %v398_v45 = vpop.permute.xlu1 %397 }
  0x9e   :  { %437 = vperm.xlu1 %929, %v27_v21   ;;  %v1181_v46 = vpop.permute.xlu0 %213  ;;  %v461_v9 = vsub.f32 %v398_v45, %v1200_v0 }
  0xa0   :  { %v477_v20 = vmul.f32 %v461_v9, %v461_v9 }
  0xa2   :  { %930 = vset.pattern.permute.xlu1 %v1029_v1  ;;  %v286_v51 = vpop.permute.xlu1 %285 }
  0xa3   :  { %v47_v52 = vpop.permute.xlu0 %46  ;;  %329 = vperm.xlu1 %930, %v1099_v12   ;;  %v346_v14 = vsub.f32 %v286_v51, %v1190_v55 }
  0xa4   :  { %v128_v30 = vsub.f32 %v47_v52, %v1193_v57  ;;  %v247_v52 = vmul.f32 %v231_v25, %v231_v25 }
  0xa5   :  { %v362_v22 = vmul.f32 %v346_v14, %v346_v14 }
  0xa7   :  { %v52_v59 = vpop.permute.xlu0 %51  ;;  %931 = vset.pattern.permute.xlu1 %v1031_v8  ;;  %v1196_v60 = vpop.permute.xlu1 %66  ;;  %v230_v8 = vsub.f32 %v170_v38, %v1185_v53 }
  0xa8   :  { %v129_v61 = vsub.f32 %v52_v59, %v1193_v57  ;;  %116 = vperm.xlu1 %931, %v30_v54  }
  0xa9   :  { %v246_v19 = vmul.f32 %v230_v8, %v230_v8 }
  0xaa   :  { %v145_v3 = vmul.f32 %v129_v61, %v129_v61 }
  0xab   :  { %v62_v4 = vpop.permute.xlu0 %61  ;;  %v1202_v5 = vpop.permute.xlu1 %71 }
  0xac   :  { %v261_v6 = vadd.f32 %v245_v62, %v145_v3  ;;  %933 = vset.pattern.permute.xlu1 %v1030_v2  ;;  %v146_v2 = vmul.f32 %v130_v11, %v130_v11  ;;  %v131_v44 = vsub.f32 %v62_v4, %v1193_v57 }
  0xad   :  { %217 = vperm.xlu1 %933, %v30_v54  }
  0xae   :  { %v377_v15 = vadd.f32 %v361_v7, %v261_v6  ;;  %v262_v27 = vadd.f32 %v246_v19, %v146_v2  ;;  %v147_v51 = vmul.f32 %v131_v44, %v131_v44  ;;  %v232_v6 = vsub.f32 %v1169_v37, %v1185_v53 }
  0xaf   :  { %v1207_v10 = vpop.permute.xlu0 %76  ;;  %v132_v7 = vsub.f32 %v1196_v60, %v1193_v57 }
  0xb0   :  { %v182_v17 = vpop.permute.xlu1 %181  ;;  %v1214_v23 = vadd.f32 %v477_v20, %v377_v15  ;;  %v378_v33 = vadd.f32 %v362_v22, %v262_v27  ;;  %v263_v61 = vadd.f32 %v247_v52, %v147_v51  ;;  %v248_v20 = vmul.f32 %v232_v6, %v232_v6 }
  0xb1   :  { %221 = vperm.xlu1 %933, %v1121_v16   ;;  %v233_v8 = vsub.f32 %v182_v17, %v1185_v53  ;;  %v148_v2 = vmul.f32 %v132_v7, %v132_v7 }
  0xb2   :  { %941 = vrsqrt.f32 %v1214_v23  ;;  %vm517_vm1 = vcmp.eq.f32.partialorder %v1214_v23, inf  ;;  %v520_v22 = vand.u32 2147483648, %v1214_v23  ;;  %vm519_vm2 = vcmp.eq.f32.partialorder %v1214_v23, 0.0 }
  0xb3   :  { %v1212_v21 = vpop.permute.xlu0 %91 }
  0xb5   :  { %935 = vset.pattern.permute.xlu1 %v1032_v13  ;;  %v402_v24 = vpop.permute.xlu1 %401 }
  0xb6   :  { %v462_v28 = vsub.f32 %v402_v24, %v1200_v0  ;;  %445 = vperm.xlu1 %935, %v1099_v12   ;;  %v144_v12 = vmul.f32 %v128_v30, %v128_v30  ;;  %v249_v24 = vmul.f32 %v233_v8, %v233_v8  ;;  %v134_v30 = vsub.f32 %v1207_v10, %v1193_v57 }
  0xb7   :  { %v1220_v32 = vpop.permute.xlu0 %106 }
  0xb8   :  { %v478_v35 = vmul.f32 %v462_v28, %v462_v28  ;;  %v260_v50 = vadd.f32 %v244_v47, %v144_v12 }
  0xba   :  { %v1225_v38 = vadd.f32 %v478_v35, %v378_v33  ;;  %936 = vset.pattern.permute.xlu1 %v1029_v1  ;;  %v294_v40 = vpop.permute.xlu1 %293  ;;  %v347_v1 = vsub.f32 %v1159_v29, %v1190_v55  ;;  %v376_v62 = vadd.f32 %v360_v49, %v260_v50  ;;  %v150_v50 = vmul.f32 %v134_v30, %v134_v30 }
  0xbb   :  { %333 = vperm.xlu1 %936, %v30_v54   ;;  %v1231_v45 = vpop.permute.xlu0 %121  ;;  %v348_v14 = vsub.f32 %v294_v40, %v1190_v55  ;;  %v264_v40 = vadd.f32 %v248_v20, %v148_v2  ;;  %v235_v30 = vsub.f32 %v1173_v39, %v1185_v53 }
  0xbc   :  { %943 = vrsqrt.f32 %v1225_v38  ;;  %v942_v58 = vpop.eup %941  ;;  %v363_v59 = vmul.f32 %v347_v1, %v347_v1  ;;  %vm524_vm3 = vcmp.eq.f32.partialorder %v1225_v38, inf  ;;  %vm526_vm4 = vcmp.eq.f32.partialorder %v1225_v38, 0.0 }
  0xbd   :  { %v350_v1 = vsub.f32 %v1163_v31, %v1190_v55 }
  0xbe   :  { %v298_v48 = vpop.permute.xlu1 %297  ;;  %v379_v9 = vadd.f32 %v363_v59, %v263_v61 }
  0xbf   :  { %937 = vset.pattern.permute.xlu1 %v1032_v13  ;;  %v516_v13 = vmul.f32 %v942_v58, %v1214_v23  ;;  %v349_v19 = vsub.f32 %v298_v48, %v1190_v55 }
  0xc0   :  { %v394_v26 = vpop.permute.xlu0 %393  ;;  %449 = vperm.xlu1 %937, %v30_v54  }
  0xc1   :  { %v460_v56 = vsub.f32 %v394_v26, %v1200_v0  ;;  %v518_v60 = vsel %vm517_vm1, %v1214_v23, %v516_v13  ;;  %v365_v33 = vmul.f32 %v349_v19, %v349_v19  ;;  %v527_v23 = vand.u32 2147483648, %v1225_v38 }
  0xc2   :  { %v1265_v27 = vsel %vm519_vm2, %v520_v22, %v518_v60  ;;  %v366_v13 = vmul.f32 %v350_v1, %v350_v1 }
  0xc3   :  { %v476_v63 = vmul.f32 %v460_v56, %v460_v56  ;;  %v1240_v41 = vpop.permute.xlu1 %81  ;;  %v621_v47 = vsub.f32 0.0, %v1265_v27  ;;  %v669_v60 = vadd.f32 3.0, %v1265_v27 }
  0xc4   :  { %v406_v3 = vpop.permute.xlu0 %405  ;;  %453 = vperm.xlu1 %937, %v1121_v16   ;;  %v133_v16 = vsub.f32 %v1202_v5, %v1193_v57  ;;  %v364_v5 = vmul.f32 %v348_v14, %v348_v14  ;;  %v135_v39 = vsub.f32 %v1240_v41, %v1193_v57 }
  0xc5   :  { %v1243_v29 = vadd.f32 %v476_v63, %v376_v62  ;;  %v463_v4 = vsub.f32 %v406_v3, %v1200_v0  ;;  %v638_v62 = vmul.f32 1.442695, %v621_v47  ;;  %v251_v47 = vmul.f32 %v235_v30, %v235_v30 }
  0xc6   :  { %v944_v54 = vpop.eup %943  ;;  %v149_v28 = vmul.f32 %v133_v16, %v133_v16  ;;  %v380_v25 = vadd.f32 %v364_v5, %v264_v40 }
  0xc7   :  { %945 = vrsqrt.f32 %v1243_v29  ;;  %v479_v11 = vmul.f32 %v463_v4, %v463_v4  ;;  %v523_v17 = vmul.f32 %v944_v54, %v1225_v38  ;;  %vm510_vm5 = vcmp.eq.f32.partialorder %v1243_v29, inf }
  0xc8   :  { %v186_v15 = vpop.permute.xlu1 %185  ;;  %v265_v44 = vadd.f32 %v249_v24, %v149_v28  ;;  %v418_v56 = vpop.permute.xlu0 %417  ;;  %vm512_vm6 = vcmp.eq.f32.partialorder %v1243_v29, 0.0  ;;  %v353_v24 = vsub.f32 %v1165_v34, %v1190_v55 }
  0xc9   :  { %v1258_v37 = vadd.f32 %v479_v11, %v379_v9  ;;  %v525_v36 = vsel %vm524_vm3, %v1225_v38, %v523_v17  ;;  %v234_v43 = vsub.f32 %v186_v15, %v1185_v53  ;;  %v513_v38 = vand.u32 2147483648, %v1243_v29 }
  0xca   :  { %v1276_v49 = vsel %vm526_vm4, %v527_v23, %v525_v36  ;;  %v381_v51 = vadd.f32 %v365_v33, %v265_v44  ;;  %v466_v54 = vsub.f32 %v418_v56, %v1200_v0  ;;  %v369_v34 = vmul.f32 %v353_v24, %v353_v24 }
  0xcb   :  { %947 = vrsqrt.f32 %v1258_v37  ;;  %v250_v52 = vmul.f32 %v234_v43, %v234_v43  ;;  %v622_v63 = vsub.f32 0.0, %v1276_v49  ;;  %vm531_vm7 = vcmp.eq.f32.partialorder %v1258_v37, inf }
  0xcc   :  { %v534_v14 = vand.u32 2147483648, %v1258_v37  ;;  %vm533_vm8 = vcmp.eq.f32.partialorder %v1258_v37, 0.0  ;;  %v482_v2 = vmul.f32 %v466_v54, %v466_v54  ;;  %v670_v43 = vadd.f32 3.0, %v1276_v49 }
  0xcd   :  { %v410_v35 = vpop.permute.xlu1 %409  ;;  %v266_v7 = vadd.f32 %v250_v52, %v150_v50  ;;  %v640_v15 = vmul.f32 1.442695, %v622_v63 }
  0xce   :  { %v464_v12 = vsub.f32 %v410_v35, %v1200_v0  ;;  %v685_v35 = vmul.f32 %v669_v60, %v1265_v27  ;;  %v686_v41 = vmul.f32 %v670_v43, %v1276_v49 }
  0xcf   :  { %v382_v20 = vadd.f32 %v366_v13, %v266_v7 }
  0xd0   :  { %v480_v48 = vmul.f32 %v464_v12, %v464_v12 }
  0xd1   :  { %v946_v10 = vpop.eup %945  ;;  %v414_v26 = vpop.permute.xlu1 %413  ;;  %v1309_v40 = vadd.f32 %v482_v2, %v382_v20 }
  0xd2   :  { %v1280_v58 = vadd.f32 %v480_v48, %v380_v25  ;;  %v465_v59 = vsub.f32 %v414_v26, %v1200_v0  ;;  %v509_v61 = vmul.f32 %v946_v10, %v1243_v29  ;;  %v701_v10 = vadd.f32 3.0, %v685_v35 }
  0xd3   :  { %vm552_vm14 = vcmp.eq.f32.partialorder %v1309_v40, inf  ;;  %vm554_vm15 = vcmp.eq.f32.partialorder %v1309_v40, 0.0 }
  0xd4   :  { %949 = vrsqrt.f32 %v1280_v58  ;;  %v481_v31 = vmul.f32 %v465_v59, %v465_v59  ;;  %v511_v3 = vsel %vm510_vm5, %v1243_v29, %v509_v61  ;;  %vm538_vm9 = vcmp.eq.f32.partialorder %v1280_v58, inf }
  0xd5   :  { %v948_v4 = vpop.eup %947  ;;  %v514_v6 = vsel %vm512_vm6, %v513_v38, %v511_v3  ;;  %951 = vpow2.f32 %v638_v62  ;;  %vm540_vm10 = vcmp.eq.f32.partialorder %v1280_v58, 0.0  ;;  %v151_v62 = vmul.f32 %v135_v39, %v135_v39 }
  0xd6   :  { %v1291_v8 = vadd.f32 %v481_v31, %v381_v51  ;;  %v306_v9 = vpop.permute.xlu1 %305  ;;  %v620_v11 = vsub.f32 0.0, %v514_v6  ;;  %v530_v16 = vmul.f32 %v948_v4, %v1258_v37  ;;  %v668_v28 = vadd.f32 3.0, %v514_v6 }
  0xd7   :  { %v351_v51 = vsub.f32 %v306_v9, %v1190_v55 }
  0xd8   :  { %953 = vrsqrt.f32 %v1291_v8  ;;  %v636_v29 = vmul.f32 1.442695, %v620_v11  ;;  %v532_v19 = vsel %vm531_vm7, %v1258_v37, %v530_v16  ;;  %v137_v37 = vsub.f32 %v1212_v21, %v1193_v57 }
  0xd9   :  { %v535_v17 = vsel %vm533_vm8, %v534_v14, %v532_v19  ;;  %v684_v12 = vmul.f32 %v668_v28, %v514_v6  ;;  %v541_v21 = vand.u32 2147483648, %v1280_v58  ;;  %vm545_vm11 = vcmp.eq.f32.partialorder %v1291_v8, inf  ;;  %v430_v28 = vpop.permute.xlu0 %429 }
  0xda   :  { %955 = vpow2.f32 %v636_v29  ;;  %v623_v22 = vsub.f32 0.0, %v535_v17  ;;  %v671_v23 = vadd.f32 3.0, %v535_v17  ;;  %v153_v48 = vmul.f32 %v137_v37, %v137_v37 }
  0xdb   :  { %v1302_v5 = vpop.permute.xlu1 %86  ;;  %957 = vpow2.f32 %v640_v15  ;;  %v700_v52 = vadd.f32 3.0, %v684_v12  ;;  %vm547_vm12 = vcmp.eq.f32.partialorder %v1291_v8, 0.0  ;;  %v367_v54 = vmul.f32 %v351_v51, %v351_v51 }
  0xdc   :  { %v642_v33 = vmul.f32 1.442695, %v623_v22  ;;  %v687_v56 = vmul.f32 %v671_v23, %v535_v17  ;;  %v702_v6 = vadd.f32 3.0, %v686_v41  ;;  %v267_v19 = vadd.f32 %v251_v47, %v151_v62 }
  0xdd   :  { %v1035_v12 = vmov 0.0   ;;  %v469_v23 = vsub.f32 %v430_v28, %v1200_v0  ;;  %v555_v41 = vand.u32 2147483648, %v1309_v40 }
  0xde   :  { %v950_v36 = vpop.eup %949  ;;  %959 = vpow2.f32 %v642_v33  ;;  %v703_v14 = vadd.f32 3.0, %v687_v56  ;;  %v383_v24 = vadd.f32 %v367_v54, %v267_v19  ;;  %867 = vmatprep.mubr.msk.f32.mxu0 %vm1034_vm13, %v1035_v12 }
  0xdf   :  { %v537_v44 = vmul.f32 %v950_v36, %v1280_v58  ;;  %v952_v27 = vpop.eup %951  ;;  %961 = vrsqrt.f32 %v1309_v40 }
  0xe0   :  { %v1315_v25 = vpop.permute.xlu1 %193  ;;  %v717_v31 = vmul.f32 %v952_v27, %v701_v10  ;;  %v485_v27 = vmul.f32 %v469_v23, %v469_v23 }
  0xe1   :  { %v539_v1 = vsel %vm538_vm9, %v1280_v58, %v537_v44  ;;  %v548_v58 = vand.u32 2147483648, %v1291_v8 }
  0xe2   :  { %v954_v50 = vpop.eup %953  ;;  %v542_v26 = vsel %vm540_vm10, %v541_v21, %v539_v1 }
  0xe3   :  { %v544_v59 = vmul.f32 %v954_v50, %v1291_v8  ;;  %v624_v61 = vsub.f32 0.0, %v542_v26  ;;  %v672_v37 = vadd.f32 3.0, %v542_v26 }
  0xe4   :  { %v956_v38 = vpop.eup %955  ;;  %v198_v63 = vpop.permute.xlu1 %197 }
  0xe5   :  { %v958_v3 = vpop.eup %957  ;;  %v237_v4 = vsub.f32 %v198_v63, %v1185_v53  ;;  %v716_v13 = vmul.f32 %v956_v38, %v700_v52  ;;  %v546_v49 = vsel %vm545_vm11, %v1291_v8, %v544_v59  ;;  %v644_v9 = vmul.f32 1.442695, %v624_v61 }
  0xe6   :  { %v549_v7 = vsel %vm547_vm12, %v548_v58, %v546_v49  ;;  %v718_v60 = vmul.f32 %v958_v3, %v702_v6  ;;  %v236_v58 = vsub.f32 %v1315_v25, %v1185_v53 }
  0xe7   :  { %v253_v11 = vmul.f32 %v237_v4, %v237_v4  ;;  %v871_v16 = vpack.c.bf16 %v717_v31, %v716_v13  ;;  %v625_v15 = vsub.f32 0.0, %v549_v7  ;;  %963 = vpow2.f32 %v644_v9 }
  0xe8   :  { %v960_v29 = vpop.eup %959  ;;  %v673_v43 = vadd.f32 3.0, %v549_v7 }
  0xe9   :  { %v269_v17 = vadd.f32 %v253_v11, %v153_v48  ;;  %v422_v20 = vpop.permute.xlu1 %421  ;;  %872 = vmatpush3.bf16.msra.mxu0 %v871_v16  ;;  %v719_v2 = vmul.f32 %v960_v29, %v703_v14  ;;  %v646_v22 = vmul.f32 1.442695, %v625_v15  ;;  %v962_v35 = vpop.eup %961 }
  0xea   :  { %v467_v8 = vsub.f32 %v422_v20, %v1200_v0  ;;  %873 = vmatprep.subr.bf16.mxu0 %v1033_v18  ;;  %v551_v39 = vmul.f32 %v962_v35, %v1309_v40  ;;  %v689_v21 = vmul.f32 %v673_v43, %v549_v7  ;;  %v252_v7 = vmul.f32 %v236_v58, %v236_v58 }
  0xeb   :  { %v385_v30 = vadd.f32 %v369_v34, %v269_v17  ;;  %v874_v33 = vpack.c.bf16 %v719_v2, %v718_v60  ;;  %965 = vpow2.f32 %v646_v22  ;;  %v688_v34 = vmul.f32 %v672_v37, %v542_v26 }
  0xec   :  { %v483_v36 = vmul.f32 %v467_v8, %v467_v8  ;;  %v553_v1 = vsel %vm552_vm14, %v1309_v40, %v551_v39  ;;  %v705_v51 = vadd.f32 3.0, %v689_v21  ;;  %v136_v40 = vsub.f32 %v1302_v5, %v1193_v57 }
  0xed   :  { %875 = vmatpush3.bf16.msra.mxu0 %v874_v33  ;;  %v704_v50 = vadd.f32 3.0, %v688_v34  ;;  %v501_v56 = vadd.f32 %v485_v27, %v385_v30  ;;  %v556_v26 = vsel %vm554_vm15, %v555_v41, %v553_v1  ;;  %v238_v1 = vsub.f32 %v1179_v42, %v1185_v53 }
  0xee   :  { %v499_v44 = vadd.f32 %v483_v36, %v383_v24  ;;  %v310_v47 = vpop.permute.xlu1 %309  ;;  %876 = vmatprep.subr.bf16.mxu0 %v1033_v18  ;;  %v626_v63 = vsub.f32 0.0, %v556_v26  ;;  %v152_v25 = vmul.f32 %v136_v40, %v136_v40  ;;  %v674_v20 = vadd.f32 3.0, %v556_v26 }
  0xef   :  { %v352_v4 = vsub.f32 %v310_v47, %v1190_v55  ;;  %vm573_vm2 = vcmp.eq.f32.partialorder %v501_v56, inf  ;;  %v576_v12 = vand.u32 2147483648, %v501_v56  ;;  %vm575_vm3 = vcmp.eq.f32.partialorder %v501_v56, 0.0 }
  0xf0   :  { %967 = vrsqrt.f32 %v499_v44  ;;  %vm559_vm0 = vcmp.eq.f32.partialorder %v499_v44, inf  ;;  %v562_v49 = vand.u32 2147483648, %v499_v44  ;;  %vm561_vm1 = vcmp.eq.f32.partialorder %v499_v44, 0.0 }
  0xf1   :  { %v964_v48 = vpop.eup %963  ;;  %969 = vrsqrt.f32 %v501_v56  ;;  %v648_v6 = vmul.f32 1.442695, %v626_v63  ;;  %v368_v16 = vmul.f32 %v352_v4, %v352_v4  ;;  %v268_v29 = vadd.f32 %v252_v7, %v152_v25 }
  0xf2   :  { %v720_v59 = vmul.f32 %v964_v48, %v704_v50  ;;  %v690_v28 = vmul.f32 %v674_v20, %v556_v26 }
  0xf3   :  { %v1336_v10 = vpop.permute.xlu1 %96  ;;  %971 = vpow2.f32 %v648_v6  ;;  %v384_v60 = vadd.f32 %v368_v16, %v268_v29 }
  0xf4   :  { %v706_v36 = vadd.f32 3.0, %v690_v28  ;;  %v138_v50 = vsub.f32 %v1336_v10, %v1193_v57 }
  0xf5   :  { %v966_v52 = vpop.eup %965 }
  0xf6   :  { %v721_v61 = vmul.f32 %v966_v52, %v705_v51  ;;  %v442_v52 = vpop.permute.xlu0 %441  ;;  %v154_v63 = vmul.f32 %v138_v50, %v138_v50 }
  0xf7   :  { %v1341_v38 = vpop.permute.xlu1 %101 }
  0xf8   :  { %v877_v62 = vpack.c.bf16 %v721_v61, %v720_v59  ;;  %v139_v10 = vsub.f32 %v1341_v38, %v1193_v57 }
  0xfa   :  { %v968_v31 = vpop.eup %967  ;;  %878 = vmatpush3.bf16.msra.mxu0 %v877_v62  ;;  %v254_v62 = vmul.f32 %v238_v1, %v238_v1  ;;  %v155_v25 = vmul.f32 %v139_v10, %v139_v10 }
  0xfb   :  { %879 = vmatprep.subr.bf16.mxu0 %v1033_v18  ;;  %v558_v3 = vmul.f32 %v968_v31, %v499_v44  ;;  %v970_v5 = vpop.eup %969 }
  0xfc   :  { %v206_v13 = vpop.permute.xlu1 %205  ;;  %v572_v8 = vmul.f32 %v970_v5, %v501_v56  ;;  %v270_v6 = vadd.f32 %v254_v62, %v154_v63  ;;  %v241_v63 = vsub.f32 %v1181_v46, %v1185_v53 }
  0xfd   :  { %v560_v54 = vsel %vm559_vm0, %v499_v44, %v558_v3  ;;  %v972_v37 = vpop.eup %971  ;;  %v239_v42 = vsub.f32 %v206_v13, %v1185_v53  ;;  %v140_v13 = vsub.f32 %v1220_v32, %v1193_v57 }
  0xfe   :  { %v563_v9 = vsel %vm561_vm1, %v562_v49, %v560_v54  ;;  %v574_v35 = vsel %vm573_vm2, %v501_v56, %v572_v8  ;;  %v722_v44 = vmul.f32 %v972_v37, %v706_v36  ;;  %vm802_vm2 = vcmask 59392  }
  0xff   :  { %v627_v11 = vsub.f32 0.0, %v563_v9  ;;  %v675_v2 = vadd.f32 3.0, %v563_v9  ;;  %v577_v39 = vsel %vm575_vm3, %v576_v12, %v574_v35  ;;  %v255_v7 = vmul.f32 %v239_v42, %v239_v42 }
 0x100   :  { %v629_v27 = vsub.f32 0.0, %v577_v39  ;;  %v677_v38 = vadd.f32 3.0, %v577_v39 }
 0x101   :  { %v426_v14 = vpop.permute.xlu1 %425  ;;  %v650_v15 = vmul.f32 1.442695, %v627_v11  ;;  %v691_v30 = vmul.f32 %v675_v2, %v563_v9  ;;  %v326_v9 = vpop.permute.xlu0 %325 }
 0x102   :  { %v468_v19 = vsub.f32 %v426_v14, %v1200_v0  ;;  %v654_v26 = vmul.f32 1.442695, %v629_v27  ;;  %v356_v5 = vsub.f32 %v326_v9, %v1190_v55 }
 0x103   :  { %973 = vpow2.f32 %v650_v15  ;;  %v707_v43 = vadd.f32 3.0, %v691_v30  ;;  %v472_v30 = vsub.f32 %v442_v52, %v1200_v0 }
 0x104   :  { %v484_v17 = vmul.f32 %v468_v19, %v468_v19  ;;  %v372_v37 = vmul.f32 %v356_v5, %v356_v5 }
 0x106   :  { %v500_v22 = vadd.f32 %v484_v17, %v384_v60  ;;  %v318_v24 = vpop.permute.xlu1 %317  ;;  %v271_v17 = vadd.f32 %v255_v7, %v155_v25 }
 0x107   :  { %v354_v41 = vsub.f32 %v318_v24, %v1190_v55  ;;  %v693_v24 = vmul.f32 %v677_v38, %v577_v39 }
 0x108   :  { %975 = vrsqrt.f32 %v500_v22  ;;  %vm566_vm4 = vcmp.eq.f32.partialorder %v500_v22, inf  ;;  %v569_v59 = vand.u32 2147483648, %v500_v22  ;;  %vm568_vm5 = vcmp.eq.f32.partialorder %v500_v22, 0.0 }
 0x109   :  { %v370_v3 = vmul.f32 %v354_v41, %v354_v41  ;;  %977 = vpow2.f32 %v654_v26 }
 0x10a   :  { %v322_v33 = vpop.permute.xlu1 %321 }
 0x10b   :  { %v355_v40 = vsub.f32 %v322_v33, %v1190_v55  ;;  %v386_v16 = vadd.f32 %v370_v3, %v270_v6 }
 0x10d   :  { %v974_v23 = vpop.eup %973  ;;  %v371_v14 = vmul.f32 %v355_v40, %v355_v40 }
 0x10e   :  { %v723_v47 = vmul.f32 %v974_v23, %v707_v43  ;;  %v709_v23 = vadd.f32 3.0, %v693_v24 }
 0x10f   :  { %v1350_v34 = vpop.permute.xlu1 %111  ;;  %v387_v8 = vadd.f32 %v371_v14, %v271_v17 }
 0x110   :  { %v880_v21 = vpack.c.bf16 %v723_v47, %v722_v44  ;;  %v488_v47 = vmul.f32 %v472_v30, %v472_v30 }
 0x112   :  { %v976_v48 = vpop.eup %975  ;;  %881 = vmatpush3.bf16.msra.mxu0 %v880_v21 }
 0x113   :  { %882 = vmatprep.subr.bf16.mxu0 %v1033_v18  ;;  %v565_v51 = vmul.f32 %v976_v48, %v500_v22  ;;  %v978_v43 = vpop.eup %977 }
 0x114   :  { %v210_v56 = vpop.permute.xlu1 %209  ;;  %v725_v48 = vmul.f32 %v978_v43, %v709_v23 }
 0x115   :  { %v567_v61 = vsel %vm566_vm4, %v500_v22, %v565_v51  ;;  %v240_v4 = vsub.f32 %v210_v56, %v1185_v53  ;;  %v156_v22 = vmul.f32 %v140_v13, %v140_v13 }
 0x116   :  { %v570_v31 = vsel %vm568_vm5, %v569_v59, %v567_v61  ;;  %v141_v59 = vsub.f32 %v1350_v34, %v1193_v57 }
 0x117   :  { %v628_v58 = vsub.f32 0.0, %v570_v31  ;;  %v676_v29 = vadd.f32 3.0, %v570_v31  ;;  %v256_v19 = vmul.f32 %v240_v4, %v240_v4 }
 0x118   :  { %v157_v40 = vmul.f32 %v141_v59, %v141_v59 }
 0x119   :  { %v434_v49 = vpop.permute.xlu1 %433  ;;  %v652_v54 = vmul.f32 1.442695, %v628_v58  ;;  %v692_v28 = vmul.f32 %v676_v29, %v570_v31  ;;  %v272_v33 = vadd.f32 %v256_v19, %v156_v22  ;;  %v143_v22 = vsub.f32 %v1231_v45, %v1193_v57 }
 0x11a   :  { %v470_v11 = vsub.f32 %v434_v49, %v1200_v0 }
 0x11b   :  { %979 = vpow2.f32 %v652_v54  ;;  %v708_v12 = vadd.f32 3.0, %v692_v28  ;;  %v388_v21 = vadd.f32 %v372_v37, %v272_v33  ;;  %v257_v54 = vmul.f32 %v241_v63, %v241_v63 }
 0x11c   :  { %v486_v15 = vmul.f32 %v470_v11, %v470_v11  ;;  %v159_v43 = vmul.f32 %v143_v22, %v143_v22 }
 0x11d   :  { %v438_v60 = vpop.permute.xlu1 %437  ;;  %v1369_v50 = vadd.f32 %v488_v47, %v388_v21  ;;  %v273_v9 = vadd.f32 %v257_v54, %v157_v40 }
 0x11e   :  { %v502_v20 = vadd.f32 %v486_v15, %v386_v16  ;;  %v471_v2 = vsub.f32 %v438_v60, %v1200_v0  ;;  %v338_v60 = vpop.permute.xlu0 %337 }
 0x11f   :  { %v359_v33 = vsub.f32 %v338_v60, %v1190_v55  ;;  %vm594_vm10 = vcmp.eq.f32.partialorder %v1369_v50, inf  ;;  %vm596_vm11 = vcmp.eq.f32.partialorder %v1369_v50, 0.0 }
 0x120   :  { %981 = vrsqrt.f32 %v502_v20  ;;  %v487_v32 = vmul.f32 %v471_v2, %v471_v2  ;;  %vm580_vm6 = vcmp.eq.f32.partialorder %v502_v20, inf  ;;  %v583_v56 = vand.u32 2147483648, %v502_v20 }
 0x121   :  { %vm582_vm7 = vcmp.eq.f32.partialorder %v502_v20, 0.0 }
 0x122   :  { %v503_v35 = vadd.f32 %v487_v32, %v387_v8  ;;  %v330_v36 = vpop.permute.xlu1 %329 }
 0x123   :  { %v357_v42 = vsub.f32 %v330_v36, %v1190_v55 }
 0x124   :  { %983 = vrsqrt.f32 %v503_v35  ;;  %vm587_vm8 = vcmp.eq.f32.partialorder %v503_v35, inf  ;;  %v590_v3 = vand.u32 2147483648, %v503_v35  ;;  %vm589_vm9 = vcmp.eq.f32.partialorder %v503_v35, 0.0 }
 0x125   :  { %v980_v44 = vpop.eup %979  ;;  %985 = vrsqrt.f32 %v1369_v50  ;;  %v373_v6 = vmul.f32 %v357_v42, %v357_v42 }
 0x126   :  { %v724_v27 = vmul.f32 %v980_v44, %v708_v12 }
 0x127   :  { %v117_v39 = vpop.permute.xlu1 %116  ;;  %v389_v38 = vadd.f32 %v373_v6, %v273_v9 }
 0x128   :  { %v883_v1 = vpack.c.bf16 %v725_v48, %v724_v27  ;;  %v142_v5 = vsub.f32 %v117_v39, %v1193_v57  ;;  %v597_v57 = vand.u32 2147483648, %v1369_v50  ;;  %v375_v27 = vmul.f32 %v359_v33, %v359_v33 }
 0x12a   :  { %v982_v51 = vpop.eup %981  ;;  %884 = vmatpush3.bf16.msra.mxu0 %v883_v1 }
 0x12b   :  { %885 = vmatprep.subr.bf16.mxu0 %v1033_v18  ;;  %v579_v41 = vmul.f32 %v982_v51, %v502_v20 }
 0x12c   :  { %v218_v52 = vpop.permute.xlu1 %217 }
 0x12d   :  { %v581_v61 = vsel %vm580_vm6, %v502_v20, %v579_v41  ;;  %v242_v16 = vsub.f32 %v218_v52, %v1185_v53 }
 0x12e   :  { %v984_v26 = vpop.eup %983  ;;  %v584_v62 = vsel %vm582_vm7, %v583_v56, %v581_v61 }
 0x12f   :  { %v586_v31 = vmul.f32 %v984_v26, %v503_v35  ;;  %v630_v10 = vsub.f32 0.0, %v584_v62  ;;  %v986_v25 = vpop.eup %985  ;;  %v678_v15 = vadd.f32 3.0, %v584_v62  ;;  %v258_v8 = vmul.f32 %v242_v16, %v242_v16 }
 0x130   :  { %v222_v58 = vpop.permute.xlu1 %221  ;;  %v593_v2 = vmul.f32 %v986_v25, %v1369_v50 }
 0x131   :  { %v588_v4 = vsel %vm587_vm8, %v503_v35, %v586_v31  ;;  %v656_v34 = vmul.f32 1.442695, %v630_v10  ;;  %v243_v19 = vsub.f32 %v222_v58, %v1185_v53  ;;  %v694_v32 = vmul.f32 %v678_v15, %v584_v62 }
 0x132   :  { %v591_v49 = vsel %vm589_vm9, %v590_v3, %v588_v4  ;;  %v158_v53 = vmul.f32 %v142_v5, %v142_v5  ;;  %v595_v35 = vsel %vm594_vm10, %v1369_v50, %v593_v2 }
 0x133   :  { %v631_v7 = vsub.f32 0.0, %v591_v49  ;;  %987 = vpow2.f32 %v656_v34  ;;  %v679_v29 = vadd.f32 3.0, %v591_v49  ;;  %v259_v30 = vmul.f32 %v243_v19, %v243_v19 }
 0x134   :  { %v274_v45 = vadd.f32 %v258_v8, %v158_v53  ;;  %v710_v44 = vadd.f32 3.0, %v694_v32  ;;  %v598_v48 = vsel %vm596_vm11, %v597_v57, %v595_v35 }
 0x135   :  { %v446_v11 = vpop.permute.xlu1 %445  ;;  %v658_v13 = vmul.f32 1.442695, %v631_v7  ;;  %v695_v28 = vmul.f32 %v679_v29, %v591_v49  ;;  %v632_v26 = vsub.f32 0.0, %v598_v48  ;;  %v680_v49 = vadd.f32 3.0, %v598_v48 }
 0x136   :  { %v473_v46 = vsub.f32 %v446_v11, %v1200_v0 }
 0x137   :  { %989 = vpow2.f32 %v658_v13  ;;  %v711_v47 = vadd.f32 3.0, %v695_v28  ;;  %v660_v3 = vmul.f32 1.442695, %v632_v26  ;;  %v696_v13 = vmul.f32 %v680_v49, %v598_v48 }
 0x138   :  { %v489_v14 = vmul.f32 %v473_v46, %v473_v46 }
 0x139   :  { %v712_v5 = vadd.f32 3.0, %v696_v13 }
 0x13a   :  { %v505_v17 = vadd.f32 %v489_v14, %v389_v38  ;;  %v334_v20 = vpop.permute.xlu1 %333 }
 0x13b   :  { %v358_v24 = vsub.f32 %v334_v20, %v1190_v55  ;;  %v275_v55 = vadd.f32 %v259_v30, %v159_v43 }
 0x13c   :  { %991 = vrsqrt.f32 %v505_v17  ;;  %vm601_vm12 = vcmp.eq.f32.partialorder %v505_v17, inf  ;;  %v604_v10 = vand.u32 2147483648, %v505_v17  ;;  %vm603_vm13 = vcmp.eq.f32.partialorder %v505_v17, 0.0 }
 0x13d   :  { %v374_v37 = vmul.f32 %v358_v24, %v358_v24  ;;  %v988_v36 = vpop.eup %987  ;;  %v391_v62 = vadd.f32 %v375_v27, %v275_v55 }
 0x13e   :  { %v726_v51 = vmul.f32 %v988_v36, %v710_v44 }
 0x13f   :  { %v450_v12 = vpop.permute.xlu1 %449  ;;  %v390_v39 = vadd.f32 %v374_v37, %v274_v45 }
 0x140   :  { %v474_v23 = vsub.f32 %v450_v12, %v1200_v0 }
 0x141   :  { %v990_v21 = vpop.eup %989 }
 0x142   :  { %v490_v1 = vmul.f32 %v474_v23, %v474_v23  ;;  %v727_v41 = vmul.f32 %v990_v21, %v711_v47  ;;  %v32_v23 = vld [vmem:[%s1412_s2] sm:$0x7] }
 0x143   :  { %v454_v52 = vpop.permute.xlu1 %453 }
 0x144   :  { %v506_v56 = vadd.f32 %v490_v1, %v390_v39  ;;  %v475_v59 = vsub.f32 %v454_v52, %v1200_v0  ;;  %v886_v61 = vpack.c.bf16 %v727_v41, %v726_v51 }
 0x146   :  { %v992_v50 = vpop.eup %991  ;;  %993 = vrsqrt.f32 %v506_v56  ;;  %v491_v63 = vmul.f32 %v475_v59, %v475_v59  ;;  %887 = vmatpush3.bf16.msra.mxu0 %v886_v61  ;;  %vm608_vm14 = vcmp.eq.f32.partialorder %v506_v56, inf  ;;  %v611_v7 = vand.u32 2147483648, %v506_v56 }
 0x147   :  { %888 = vmatprep.subr.bf16.mxu0 %v1033_v18  ;;  %v600_v42 = vmul.f32 %v992_v50, %v505_v17  ;;  %vm610_vm15 = vcmp.eq.f32.partialorder %v506_v56, 0.0 }
 0x148   :  { %v507_v31 = vadd.f32 %v491_v63, %v391_v62 }
 0x149   :  { %v602_v58 = vsel %vm601_vm12, %v505_v17, %v600_v42 }
 0x14a   :  { %995 = vrsqrt.f32 %v507_v31  ;;  %v605_v40 = vsel %vm603_vm13, %v604_v10, %v602_v58  ;;  %vm615_vm0 = vcmp.eq.f32.partialorder %v507_v31, inf  ;;  %v618_v14 = vand.u32 2147483648, %v507_v31 }
 0x14b   :  { %v633_v4 = vsub.f32 0.0, %v605_v40  ;;  %997 = vpow2.f32 %v660_v3  ;;  %v681_v54 = vadd.f32 3.0, %v605_v40  ;;  %vm617_vm1 = vcmp.eq.f32.partialorder %v507_v31, 0.0 }
 0x14d   :  { %v662_v0 = vmul.f32 1.442695, %v633_v4  ;;  %v697_v46 = vmul.f32 %v681_v54, %v605_v40 }
 0x14f   :  { %999 = vpow2.f32 %v662_v0  ;;  %v713_v60 = vadd.f32 3.0, %v697_v46 }
 0x150   :  { %v994_v34 = vpop.eup %993 }
 0x151   :  { %v607_v6 = vmul.f32 %v994_v34, %v506_v56 }
 0x153   :  { %v609_v9 = vsel %vm608_vm14, %v506_v56, %v607_v6 }
 0x154   :  { %v996_v11 = vpop.eup %995  ;;  %v612_v25 = vsel %vm610_vm15, %v611_v7, %v609_v9 }
 0x155   :  { %v614_v38 = vmul.f32 %v996_v11, %v507_v31  ;;  %v634_v16 = vsub.f32 0.0, %v612_v25  ;;  %v998_v15 = vpop.eup %997  ;;  %v682_v28 = vadd.f32 3.0, %v612_v25 }
 0x156   :  { %v728_v22 = vmul.f32 %v998_v15, %v712_v5 }
 0x157   :  { %v616_v29 = vsel %vm615_vm0, %v507_v31, %v614_v38  ;;  %v664_v19 = vmul.f32 1.442695, %v634_v16  ;;  %v698_v33 = vmul.f32 %v682_v28, %v612_v25 }
 0x158   :  { %v619_v17 = vsel %vm617_vm1, %v618_v14, %v616_v29 }
 0x159   :  { %v1000_v20 = vpop.eup %999  ;;  %v635_v2 = vsub.f32 0.0, %v619_v17  ;;  %1001 = vpow2.f32 %v664_v19  ;;  %v683_v30 = vadd.f32 3.0, %v619_v17  ;;  %v714_v35 = vadd.f32 3.0, %v698_v33 }
 0x15a   :  { %v729_v24 = vmul.f32 %v1000_v20, %v713_v60 }
 0x15b   :  { %v666_v8 = vmul.f32 1.442695, %v635_v2  ;;  %v699_v53 = vmul.f32 %v683_v30, %v619_v17 }
 0x15c   :  { %v889_v32 = vpack.c.bf16 %v729_v24, %v728_v22 }
 0x15d   :  { %1003 = vpow2.f32 %v666_v8  ;;  %v715_v36 = vadd.f32 3.0, %v699_v53 }
 0x15e   :  { %890 = vmatpush3.bf16.msra.mxu0 %v889_v32 }
 0x15f   :  { %891 = vmatprep.subr.bf16.mxu0 %v1033_v18 }
 0x163   :  { %v1002_v37 = vpop.eup %1001 }
 0x164   :  { %v730_v12 = vmul.f32 %v1002_v37, %v714_v35 }
 0x167   :  { %v1004_v43 = vpop.eup %1003 }
 0x168   :  { %v731_v57 = vmul.f32 %v1004_v43, %v715_v36 }
 0x16a   :  { %v892_v45 = vpack.c.bf16 %v731_v57, %v730_v12 }
 0x16c   :  { %893 = vmatpush3.bf16.msra.mxu0 %v892_v45 }
 0x16f   :  { %868 = vmatmul.mubr.f32.vlgmr.msra.gmra.mrb[0].mxu0 %v32_v23 }
 0x242   :  { %v798_v18 = vpop.f32.mrb[0].mxu0 }
 0x243   :  { %803 = vst.msk [vmem:[#allocation2] sm:$0x7] %vm802_vm2, %v798_v18  ;;  %v869_v44 = vpop.f32.mrb[1].mxu0 }
 0x244   :  { %1016 = shalt.err (!%p1013_p4)
}
 0x245   :  { %s1017_s24 = scalar_lea.hbm %s1413_s3, 64 }
 0x246   :  { %p1018_p5 = scmp.ne.s32.totalorder %s1413_s3, %s1017_s24  ;;  %p1021_p6 = scmp.lt.u32.totalorder %s1017_s24, %s1413_s3 }
 0x248   :  { %p1023_p7 = pnand %p1021_p6, %p1018_p5 }
 0x24a   :  { %1026 = shalt.err (!%p1023_p7)
}
 0x24b   :  { %813 = dma.vmem_to_hbm [thread:$0]  %s811_s20, 64, %s1413_s3, [#allocation3]  }
 0x24c   :  { %1027 = dma.done.wait [#allocation3], 64  }
 0x24d   :  { %1028 = vsyncadd [#allocation3], 4294967232 }
 0x24e   :  { %817 = vsyncpa [#allocation3], 1 }

</bundles_post_ra>
